<compile_context>
chip_gen: v6e
topology: v6e:2x2x1
jax: 0.10.0
libtpu: 0.0.40
codegen_flags: <defaults>
</compile_context>

<pallas_src>
import jax
import jax.numpy as jnp
from jax.experimental import pallas as pl
from jax.experimental.pallas import tpu as pltpu

_LANE = 128


def _ipg_kernel(w_ref, b_ref, x_ref, y_ref, gt_ref):
    # w_ref:  (C,)          SMEM  1x1-conv weight (f32)
    # b_ref:  (1,)          SMEM  conv bias (f32)
    # x_ref:  (C, S, 128)   VMEM  input tile (channel-major, dense spatial slabs)
    # y_ref:  (C, S, 128)   VMEM  x + x * sigmoid(gt_pre)
    # gt_ref: (1, S, 128)   VMEM  raw conv logits (pre-sigmoid), as in PyTorch
    C, S, L = x_ref.shape

    # 1x1 conv as a scalar-weighted channel accumulation on the VPU over
    # dense (S, 128) slabs.  No (C,S,128) f32 temporary, no cross-sublane
    # XLU reduce, no MXU.
    acc = jnp.full((S, L), b_ref[0], dtype=jnp.float32)
    if C <= 64:
        for c in range(C):                                    # static unroll
            acc = acc + w_ref[c] * x_ref[c].astype(jnp.float32)
    else:
        def body(c, a):
            return a + w_ref[c] * x_ref[c].astype(jnp.float32)
        acc = jax.lax.fori_loop(0, C, body, acc, unroll=8)

    gt_ref[...] = acc[None].astype(gt_ref.dtype)

    # sigmoid lowers onto the EUP (transcendental slot).  Keep everything in
    # f32 and cast once on the store (saves bf16 pack/unpack on v5e's VPU).
    scale = 1.0 + jax.nn.sigmoid(acc)                         # (S, 128) f32

    if C <= 64:
        for c in range(C):                                    # static unroll
            y_ref[c] = (x_ref[c].astype(jnp.float32) * scale).astype(y_ref.dtype)
    else:
        def wbody(c, carry):
            y_ref[c] = (x_ref[c].astype(jnp.float32) * scale).astype(y_ref.dtype)
            return carry
        jax.lax.fori_loop(0, C, wbody, 0, unroll=8)


def _vmem_budget_bytes():
    """Scoped-VMEM budget: ~70% of physical per-TC VMEM, capped at 100 MiB."""
    cap = None
    try:
        cap = getattr(pltpu.get_tpu_info(), "vmem_capacity_bytes", None)
    except Exception:
        cap = None
    if cap is None:
        cap = 64 * 1024 * 1024            # conservative default (v7x-sized)
    return int(min(cap * 0.7, 100 * 1024 * 1024))


def _choose_row_tile(S_total, C, dtype, vmem_budget, N):
    """Pick S, the number of 128-lane rows per block, sized by bytes.

    Targets ~4 MiB x blocks (HBM-roofline sized), accounts for sublane
    padding and double-buffering against the per-TensorCore VMEM budget, and
    keeps >= 2 grid steps so both TensorCores get work on megacore parts.
    """
    itemsize = jnp.dtype(dtype).itemsize
    gran = max(8, 32 // itemsize)                 # sublane granule: 8/16/32
    c_pad = ((C + gran - 1) // gran) * gran       # padded channel rows
    g_pad = gran                                  # gt's single channel pads up

    # Bytes per 128-lane row held by the pipeline: x in + y out + gt out,
    # each double-buffered, plus the kernel's f32 temporaries (acc + scale).
    per_row = 2 * (2 * c_pad + g_pad) * _LANE * itemsize + 2 * _LANE * 4

    rows_target = max(1, (4 * 1024 * 1024) // (c_pad * _LANE * itemsize))
    rows_vmem = max(1, (vmem_budget - (4 << 20)) // per_row)
    S = min(S_total, rows_target, rows_vmem)

    # Keep at least 2 grid steps (megacore) when the problem allows it.
    if N * pl.cdiv(S_total, S) < 2 and S_total >= 2 * gran:
        S = pl.cdiv(S_total, 2)

    # Layout rule: the second-minor block dim must be a sublane-granule
    # multiple unless it spans the whole axis.
    if S < S_total:
        S = max(gran, (S // gran) * gran)
        if S >= S_total:
            S = S_total

    # Mild preference for a divisor of S_total (avoids a padded tail block),
    # never dropping below ~half the chosen tile.
    if S < S_total and S_total % S != 0:
        for t in range(S, max(gran, S // 2) - 1, -gran):
            if S_total % t == 0:
                S = t
                break
    return S


def image_prediction_generator(x, weight, bias, *, donate_x=False):
    """x: (N,C,H,W); weight: (1,C,1,1); bias: (1,). Returns (y, gt_pre)."""
    N, C, H, W = x.shape
    HW = H * W
    itemsize = jnp.dtype(x.dtype).itemsize

    # Lane-pad the flattened spatial axis to a multiple of 128 so the
    # sublane-dense (C, S, 128) layout is always legal (rare in practice;
    # padded columns are zero, and are sliced off on return).
    HWp = pl.cdiv(HW, _LANE) * _LANE
    x_flat = x.reshape(N, C, HW)
    if HWp != HW:
        x_flat = jnp.pad(x_flat, ((0, 0), (0, 0), (0, HWp - HW)))
    S_total = HWp // _LANE
    x4 = x_flat.reshape(N, C, S_total, _LANE)

    w_vec = weight.reshape(C).astype(jnp.float32)      # SMEM scalars in f32
    b_vec = bias.reshape(1).astype(jnp.float32)

    vmem_budget = _vmem_budget_bytes()
    S = _choose_row_tile(S_total, C, x.dtype, vmem_budget, N)
    n_tiles = pl.cdiv(S_total, S)

    cost = pl.CostEstimate(
        flops=int(N * HWp * (4 * C + 1)),
        transcendentals=int(N * HWp),
        bytes_accessed=int((2 * C + 1) * N * HWp * itemsize),
    )

    y4, gt4 = pl.pallas_call(
        _ipg_kernel,
        out_shape=(
            jax.ShapeDtypeStruct((N, C, S_total, _LANE), x.dtype),
            jax.ShapeDtypeStruct((N, 1, S_total, _LANE), x.dtype),
        ),
        grid_spec=pltpu.PrefetchScalarGridSpec(
            num_scalar_prefetch=0,
            grid=(N, n_tiles),
            in_specs=[
                pl.BlockSpec(memory_space=pltpu.MemorySpace.SMEM),   # weight (C,)
                pl.BlockSpec(memory_space=pltpu.MemorySpace.SMEM),   # bias   (1,)
                pl.BlockSpec((None, C, S, _LANE), lambda n, t: (n, 0, t, 0)),
            ],
            out_specs=[
                pl.BlockSpec((None, C, S, _LANE), lambda n, t: (n, 0, t, 0)),
                pl.BlockSpec((None, 1, S, _LANE), lambda n, t: (n, 0, t, 0)),
            ],
        ),
        compiler_params=pltpu.CompilerParams(
            # Both axes independent -> megacore sharding even at N == 1.
            dimension_semantics=("parallel", "parallel"),
            vmem_limit_bytes=vmem_budget,
        ),
        cost_estimate=cost,
        # Optional: donate x's buffer to y when the caller no longer needs x.
        input_output_aliases={2: 0} if donate_x else {},
    )(w_vec, b_vec, x4)

    y = y4.reshape(N, C, HWp)[:, :, :HW].reshape(N, C, H, W)
    gt = gt4.reshape(N, 1, HWp)[:, :, :HW].reshape(N, 1, H, W)
    return y, gt


if __name__ == "__main__":
    key = jax.random.PRNGKey(0)
    kx, kw, kb = jax.random.split(key, 3)

    N, C, H, W = 2, 4, 16, 16
    x = jax.random.normal(kx, (N, C, H, W), dtype=jnp.float32)

    # Deterministic Conv2d(C -> 1, k=1) parameters (uniform fan-in init).
    bound = 1.0 / (C ** 0.5)
    weight = jax.random.uniform(kw, (1, C, 1, 1), jnp.float32, -bound, bound)
    bias = jax.random.uniform(kb, (1,), jnp.float32, -bound, bound)

    y, gt_pre = image_prediction_generator(x, weight, bias)
    jax.block_until_ready((y, gt_pre))

    # Plain-JAX reference (matches the PyTorch forward exactly: second output
    # is the *pre-sigmoid* conv logits).
    logits = jnp.einsum("nchw,c->nhw", x, weight[0, :, 0, 0])[:, None] + bias[0]
    y_ref = x + x * jax.nn.sigmoid(logits)
    assert jnp.allclose(gt_pre, logits, atol=1e-5, rtol=1e-5), "gt_pre mismatch"
    assert jnp.allclose(y, y_ref, atol=1e-5, rtol=1e-5), "y mismatch"

    print("KERNEL_OK")
</pallas_src>

<mosaic_0001>
module attributes {stable_mosaic.version = 11 : i64} {
  func.func @_ipg_kernel(%arg0: i32, %arg1: i32, %arg2: memref<4xf32, #tpu.memory_space<smem>>, %arg3: memref<1xf32, #tpu.memory_space<smem>>, %arg4: memref<1x4x2x128xf32, #tpu.memory_space<vmem>>, %arg5: memref<1x4x2x128xf32, #tpu.memory_space<vmem>>, %arg6: memref<1x1x2x128xf32, #tpu.memory_space<vmem>>) attributes {dimension_semantics = [#tpu.dimension_semantics<parallel>, #tpu.dimension_semantics<parallel>], iteration_bounds = array<i64: 2, 1>, scalar_prefetch = 0 : i64, scratch_operands = 0 : i64, tpu.core_type = #tpu.core_type<tc>, window_params = [{transform_indices = @transform_0, window_bounds = array<i64: 4>}, {transform_indices = @transform_1, window_bounds = array<i64: 1>}, {transform_indices = @transform_2, window_bounds = array<i64: 1, 4, 2, 128>}, {transform_indices = @transform_3, window_bounds = array<i64: 1, 4, 2, 128>}, {transform_indices = @transform_4, window_bounds = array<i64: 1, 1, 2, 128>}]} {
    %c0 = arith.constant 0 : index
    %0 = memref.load %arg3[%c0] : memref<1xf32, #tpu.memory_space<smem>>
    %1 = vector.broadcast %0 : f32 to vector<2x128xf32>
    %c0_0 = arith.constant 0 : index
    %2 = memref.load %arg2[%c0_0] : memref<4xf32, #tpu.memory_space<smem>>
    %c0_1 = arith.constant 0 : index
    %c0_2 = arith.constant 0 : index
    %c0_3 = arith.constant 0 : index
    %c0_4 = arith.constant 0 : index
    %3 = vector.load %arg4[%c0_1, %c0_2, %c0_3, %c0_4] : memref<1x4x2x128xf32, #tpu.memory_space<vmem>>, vector<1x1x2x128xf32>
    %4 = vector.shape_cast %3 : vector<1x1x2x128xf32> to vector<2x128xf32>
    %5 = vector.broadcast %2 : f32 to vector<2x128xf32>
    %6 = arith.mulf %5, %4 : vector<2x128xf32>
    %7 = arith.addf %1, %6 : vector<2x128xf32>
    %c1 = arith.constant 1 : index
    %8 = memref.load %arg2[%c1] : memref<4xf32, #tpu.memory_space<smem>>
    %c0_5 = arith.constant 0 : index
    %c1_6 = arith.constant 1 : index
    %c0_7 = arith.constant 0 : index
    %c0_8 = arith.constant 0 : index
    %9 = vector.load %arg4[%c0_5, %c1_6, %c0_7, %c0_8] : memref<1x4x2x128xf32, #tpu.memory_space<vmem>>, vector<1x1x2x128xf32>
    %10 = vector.shape_cast %9 : vector<1x1x2x128xf32> to vector<2x128xf32>
    %11 = vector.broadcast %8 : f32 to vector<2x128xf32>
    %12 = arith.mulf %11, %10 : vector<2x128xf32>
    %13 = arith.addf %7, %12 : vector<2x128xf32>
    %c2 = arith.constant 2 : index
    %14 = memref.load %arg2[%c2] : memref<4xf32, #tpu.memory_space<smem>>
    %c0_9 = arith.constant 0 : index
    %c2_10 = arith.constant 2 : index
    %c0_11 = arith.constant 0 : index
    %c0_12 = arith.constant 0 : index
    %15 = vector.load %arg4[%c0_9, %c2_10, %c0_11, %c0_12] : memref<1x4x2x128xf32, #tpu.memory_space<vmem>>, vector<1x1x2x128xf32>
    %16 = vector.shape_cast %15 : vector<1x1x2x128xf32> to vector<2x128xf32>
    %17 = vector.broadcast %14 : f32 to vector<2x128xf32>
    %18 = arith.mulf %17, %16 : vector<2x128xf32>
    %19 = arith.addf %13, %18 : vector<2x128xf32>
    %c3 = arith.constant 3 : index
    %20 = memref.load %arg2[%c3] : memref<4xf32, #tpu.memory_space<smem>>
    %c0_13 = arith.constant 0 : index
    %c3_14 = arith.constant 3 : index
    %c0_15 = arith.constant 0 : index
    %c0_16 = arith.constant 0 : index
    %21 = vector.load %arg4[%c0_13, %c3_14, %c0_15, %c0_16] : memref<1x4x2x128xf32, #tpu.memory_space<vmem>>, vector<1x1x2x128xf32>
    %22 = vector.shape_cast %21 : vector<1x1x2x128xf32> to vector<2x128xf32>
    %23 = vector.broadcast %20 : f32 to vector<2x128xf32>
    %24 = arith.mulf %23, %22 : vector<2x128xf32>
    %25 = arith.addf %19, %24 : vector<2x128xf32>
    %26 = vector.shape_cast %25 : vector<2x128xf32> to vector<1x2x128xf32>
    %c0_17 = arith.constant 0 : index
    %c0_18 = arith.constant 0 : index
    %c0_19 = arith.constant 0 : index
    %c0_20 = arith.constant 0 : index
    %27 = vector.load %arg6[%c0_17, %c0_18, %c0_19, %c0_20] : memref<1x1x2x128xf32, #tpu.memory_space<vmem>>, vector<1x1x2x128xf32>
    %28 = vector.shape_cast %27 : vector<1x1x2x128xf32> to vector<1x2x128xf32>
    %29 = vector.shape_cast %26 : vector<1x2x128xf32> to vector<1x1x2x128xf32>
    tpu.vector_store %arg6[%c0_17, %c0_18, %c0_19, %c0_20], %29 {strides = array<i32>} : memref<1x1x2x128xf32, #tpu.memory_space<vmem>>, vector<1x1x2x128xf32>,
    %30 = arith.negf %25 : vector<2x128xf32>
    %31 = math.exp %30 : vector<2x128xf32>
    %cst = arith.constant 1.000000e+00 : f32
    %32 = vector.broadcast %cst : f32 to vector<2x128xf32>
    %33 = arith.addf %32, %31 : vector<2x128xf32>
    %34 = arith.divf %32, %33 : vector<2x128xf32>
    %cst_21 = arith.constant 1.000000e+00 : f32
    %35 = vector.broadcast %cst_21 : f32 to vector<2x128xf32>
    %36 = arith.addf %35, %34 : vector<2x128xf32>
    %c0_22 = arith.constant 0 : index
    %c0_23 = arith.constant 0 : index
    %c0_24 = arith.constant 0 : index
    %c0_25 = arith.constant 0 : index
    %37 = vector.load %arg4[%c0_22, %c0_23, %c0_24, %c0_25] : memref<1x4x2x128xf32, #tpu.memory_space<vmem>>, vector<1x1x2x128xf32>
    %38 = vector.shape_cast %37 : vector<1x1x2x128xf32> to vector<2x128xf32>
    %39 = arith.mulf %38, %36 : vector<2x128xf32>
    %c0_26 = arith.constant 0 : index
    %c0_27 = arith.constant 0 : index
    %c0_28 = arith.constant 0 : index
    %c0_29 = arith.constant 0 : index
    %40 = vector.load %arg5[%c0_26, %c0_27, %c0_28, %c0_29] : memref<1x4x2x128xf32, #tpu.memory_space<vmem>>, vector<1x1x2x128xf32>
    %41 = vector.shape_cast %40 : vector<1x1x2x128xf32> to vector<2x128xf32>
    %42 = vector.shape_cast %39 : vector<2x128xf32> to vector<1x1x2x128xf32>
    tpu.vector_store %arg5[%c0_26, %c0_27, %c0_28, %c0_29], %42 {strides = array<i32>} : memref<1x4x2x128xf32, #tpu.memory_space<vmem>>, vector<1x1x2x128xf32>,
    %c0_30 = arith.constant 0 : index
    %c1_31 = arith.constant 1 : index
    %c0_32 = arith.constant 0 : index
    %c0_33 = arith.constant 0 : index
    %43 = vector.load %arg4[%c0_30, %c1_31, %c0_32, %c0_33] : memref<1x4x2x128xf32, #tpu.memory_space<vmem>>, vector<1x1x2x128xf32>
    %44 = vector.shape_cast %43 : vector<1x1x2x128xf32> to vector<2x128xf32>
    %45 = arith.mulf %44, %36 : vector<2x128xf32>
    %c0_34 = arith.constant 0 : index
    %c1_35 = arith.constant 1 : index
    %c0_36 = arith.constant 0 : index
    %c0_37 = arith.constant 0 : index
    %46 = vector.load %arg5[%c0_34, %c1_35, %c0_36, %c0_37] : memref<1x4x2x128xf32, #tpu.memory_space<vmem>>, vector<1x1x2x128xf32>
    %47 = vector.shape_cast %46 : vector<1x1x2x128xf32> to vector<2x128xf32>
    %48 = vector.shape_cast %45 : vector<2x128xf32> to vector<1x1x2x128xf32>
    tpu.vector_store %arg5[%c0_34, %c1_35, %c0_36, %c0_37], %48 {strides = array<i32>} : memref<1x4x2x128xf32, #tpu.memory_space<vmem>>, vector<1x1x2x128xf32>,
    %c0_38 = arith.constant 0 : index
    %c2_39 = arith.constant 2 : index
    %c0_40 = arith.constant 0 : index
    %c0_41 = arith.constant 0 : index
    %49 = vector.load %arg4[%c0_38, %c2_39, %c0_40, %c0_41] : memref<1x4x2x128xf32, #tpu.memory_space<vmem>>, vector<1x1x2x128xf32>
    %50 = vector.shape_cast %49 : vector<1x1x2x128xf32> to vector<2x128xf32>
    %51 = arith.mulf %50, %36 : vector<2x128xf32>
    %c0_42 = arith.constant 0 : index
    %c2_43 = arith.constant 2 : index
    %c0_44 = arith.constant 0 : index
    %c0_45 = arith.constant 0 : index
    %52 = vector.load %arg5[%c0_42, %c2_43, %c0_44, %c0_45] : memref<1x4x2x128xf32, #tpu.memory_space<vmem>>, vector<1x1x2x128xf32>
    %53 = vector.shape_cast %52 : vector<1x1x2x128xf32> to vector<2x128xf32>
    %54 = vector.shape_cast %51 : vector<2x128xf32> to vector<1x1x2x128xf32>
    tpu.vector_store %arg5[%c0_42, %c2_43, %c0_44, %c0_45], %54 {strides = array<i32>} : memref<1x4x2x128xf32, #tpu.memory_space<vmem>>, vector<1x1x2x128xf32>,
    %c0_46 = arith.constant 0 : index
    %c3_47 = arith.constant 3 : index
    %c0_48 = arith.constant 0 : index
    %c0_49 = arith.constant 0 : index
    %55 = vector.load %arg4[%c0_46, %c3_47, %c0_48, %c0_49] : memref<1x4x2x128xf32, #tpu.memory_space<vmem>>, vector<1x1x2x128xf32>
    %56 = vector.shape_cast %55 : vector<1x1x2x128xf32> to vector<2x128xf32>
    %57 = arith.mulf %56, %36 : vector<2x128xf32>
    %c0_50 = arith.constant 0 : index
    %c3_51 = arith.constant 3 : index
    %c0_52 = arith.constant 0 : index
    %c0_53 = arith.constant 0 : index
    %58 = vector.load %arg5[%c0_50, %c3_51, %c0_52, %c0_53] : memref<1x4x2x128xf32, #tpu.memory_space<vmem>>, vector<1x1x2x128xf32>
    %59 = vector.shape_cast %58 : vector<1x1x2x128xf32> to vector<2x128xf32>
    %60 = vector.shape_cast %57 : vector<2x128xf32> to vector<1x1x2x128xf32>
    tpu.vector_store %arg5[%c0_50, %c3_51, %c0_52, %c0_53], %60 {strides = array<i32>} : memref<1x4x2x128xf32, #tpu.memory_space<vmem>>, vector<1x1x2x128xf32>,
    return
  }
  func.func @transform_0(%arg0: i32, %arg1: i32) -> i32 {
    %c0_i32 = arith.constant 0 : i32
    %c0_i32_0 = arith.constant 0 : i32
    return %c0_i32 : i32
  }
  func.func @transform_1(%arg0: i32, %arg1: i32) -> i32 {
    %c0_i32 = arith.constant 0 : i32
    %c0_i32_0 = arith.constant 0 : i32
    return %c0_i32 : i32
  }
  func.func @transform_2(%arg0: i32, %arg1: i32) -> (i32, i32, i32, i32) {
    %c0_i32 = arith.constant 0 : i32
    %c0_i32_0 = arith.constant 0 : i32
    %c0_i32_1 = arith.constant 0 : i32
    return %arg0, %c0_i32, %arg1, %c0_i32_0 : i32, i32, i32, i32
  }
  func.func @transform_3(%arg0: i32, %arg1: i32) -> (i32, i32, i32, i32) {
    %c0_i32 = arith.constant 0 : i32
    %c0_i32_0 = arith.constant 0 : i32
    %c0_i32_1 = arith.constant 0 : i32
    return %arg0, %c0_i32, %arg1, %c0_i32_0 : i32, i32, i32, i32
  }
  func.func @transform_4(%arg0: i32, %arg1: i32) -> (i32, i32, i32, i32) {
    %c0_i32 = arith.constant 0 : i32
    %c0_i32_0 = arith.constant 0 : i32
    %c0_i32_1 = arith.constant 0 : i32
    return %arg0, %c0_i32, %arg1, %c0_i32_0 : i32, i32, i32, i32
  }
}

</mosaic_0001>

<bundles_post_ra>
// kernel: tpu_custom_call.1
= control target key start
LH: loop header
LB: loop body
LE: loop exit
PB: predicated region body
PF: predicated region fallthrough
CT: control target
= control target key end

     0   :  { %s1010_s0 = inlined_call_operand.vmem [shape: f32[4], index: 0, kind: input, shape index: {}]   ;;  %s1011_s1 = inlined_call_operand.<no memory space> [shape: f32[1], index: 1, kind: input, shape index: {}]   ;;  %s1012_s2 = inlined_call_operand.hbm [shape: f32[2,4,2,128], index: 2, kind: input, shape index: {}]   ;;  %s1013_s3 = inlined_call_operand.hbm [shape: f32[2,4,2,128], index: 3, kind: output, shape index: {0}]   ;;  %s1014_s4 = inlined_call_operand.hbm [shape: f32[2,1,2,128], index: 4, kind: output, shape index: {1}]  }
   0x1   :  { %1016 = sst [smem:[#allocation15_spill]] %s1010_s0 }
   0x2   :  { %10 = sst [smem:[#allocation2]] %s1011_s1 }
   0x3   :  { %11 = vsyncpa [#allocation6], 0 }
   0x4   :  { %12 = vsyncpa [#allocation4], 0 }
   0x5   :  { %14 = vsyncpa [#allocation4 + $0x1], 0 }
   0x6   :  { %15 = vsyncpa [#allocation5], 0 }
   0x7   :  { %17 = vsyncpa [#allocation5 + $0x1], 0 }
   0x8   :  { %18 = vsyncpa [#allocation10], 0 }
   0x9   :  { %20 = vsyncpa [#allocation10 + $0x1], 0  ;;  %s789_s17 = smov 0   ;;  %s791_s18 = smov 0  }
   0xa   :  { %s793_s19 = smov 0   ;;  %s795_s20 = smov 0  }
   0xb   :  { %s797_s21 = smov 0   ;;  %s799_s22 = smov 0  }
   0xc LB: > { %s473_s1 = sadd.s32 4294967295, %s751_s22   ;;  %s474_s23 = sadd.s32 4294967294, %s751_s22   ;;  %s751_s22 = sphi %s799_s22, %s26_s22   ;;  %s747_s21 = sphi %s797_s21, %s1034_s21   ;;  %s743_s20 = sphi %s795_s20, %s1033_s20   ;;  %s739_s19 = sphi %s793_s19, %s1032_s19   ;;  %s735_s18 = sphi %s791_s18, %s1031_s18   ;;  %s731_s17 = sphi %s789_s17, %s1030_s17  }
   0xd   : > { %s89_s24 = sadd.s32 1, %s739_s19  ;;  %p96_p0 = scmp.ne.s32.totalorder %s739_s19, %s735_s18 }
   0xe   : > { %p97_p1 = scmp.eq.s32.totalorder %s751_s22, 0  ;;  %p102_p2 = scmp.ne.s32.totalorder %s735_s18, %s731_s17 }
   0xf   : > { %p827_p3 = scmp.eq.s32.totalorder %s473_s1, 0  ;;  %p128_p4 = scmp.eq.s32.totalorder %s473_s1, 1 }
  0x10   : > { %p831_p5 = por %p97_p1, %p96_p0  ;;  %p134_p6 = scmp.eq.s32.totalorder %s474_s23, 1 }
  0x11   : > { %p837_p7 = por %p827_p3, %p102_p2  ;;  %p841_p8 = por %p128_p4, %p96_p0 }
  0x12   : > { %p845_p9 = por %p134_p6, %p102_p2  ;;  %p475_p10 = scmp.ge.s32.totalorder %s751_s22, 1 }
  0x13   : > { %s1020_s28 = scalar_select %p841_p8, 1, 0 }
  0x14   : > { %s1021_s29 = scalar_select %p845_p9, 1, 0 }
  0x15   : > { %p169_p11 = scmp.lt.s32.totalorder %s751_s22, 3  ;;  %s1022_s0 = sld [smem:[#allocation15_spill]] }
  0x16   : > { %p534_p0 = scmp.lt.s32.totalorder %s751_s22, 2  ;;  %s38_s10 = sadd.s32 1, %s747_s21 }
  0x17   : > { %p854_p12 = pnand %p475_p10, %p169_p11  ;;  %p875_p6 = scmp.ge.s32.totalorder %s38_s10, 2 }
  0x18   : > { %p864_p2 = pnand %p534_p0, %p831_p5  ;;  %s196_s12 = sand.u32 1, %s739_s19  }
  0x19   : > { %p518_p1 = pneg %p854_p12 }
  0x1b   : > { %s182_s6 = sshll.u32 %s1022_s0, 4  ;;  %p870_p4 = pnand %p518_p1, %p827_p3  ;;  %s183_s6 = int_to_ptr.vmem [resolvable:$true] %s182_s6 }
  0x1c   : > { %s594_s13 = scalar_lea.vmem %s183_s6, 16  ;;  %p602_p13 = scmp.lt.s32.totalorder %s183_s6, %s183_s6 }
  0x1d   : > { %p595_p10 = scmp.ne.s32.totalorder %s183_s6, %s594_s13  ;;  %p596_p11 = pneg %p870_p4 }
  0x1e   : > { %p603_p9 = scmp.lt.s32.totalorder %s594_s13, %s594_s13 }
  0x1f   : > { %p597_p5 = pnand %p596_p11, %p595_p10 }
  0x20   : > { %p604_p8 = por %p603_p9, %p602_p13 }
  0x21   : > { %p598_p0 = pneg %p597_p5 }
  0x23   : > { %p605_p1 = pnand %p604_p8, %p598_p0 }
  0x25   : > { %608 = shalt.err (!%p605_p1)
}
  0x26   : > { %s753_s14 = smov [#allocation3]   ;;  %s1036_s10 = smov (%p875_p6, %s38_s10), 0 }
  0x27   : > { %521 = dma.vmem_to_smem (!%p870_p4), %s183_s6, 16, %s753_s14, [#allocation6]  }
  0x28   : > { %s478_s15 = sshll.u32 %s196_s12, 3  ;;  %s84_s16 = ssub.s32 %s747_s21, %s1036_s10 }
  0x29   : > { %p87_p10 = scmp.eq.s32.totalorder %s84_s16, 0  ;;  %s506_s1 = sshll.u32 %s747_s21, 7 }
  0x2a   : > { %s207_s30 = scalar_lea.hbm %s1012_s2, %s506_s1  ;;  %s200_s5 = scalar_lea.vmem [#allocation7], %s478_s15 }
  0x2b   : > { %s208_s9 = sshll.u32 %s200_s5, 4  ;;  %s197_s0 = scalar_lea.sflag [#allocation4], %s196_s12  ;;  %s209_s9 = int_to_ptr.vmem [resolvable:$true] %s208_s9 }
  0x2c   : > { %s897_s13 = scalar_select %p87_p10, %s739_s19, %s89_s24  }
  0x2d   : > { %p611_p8 = pneg %p864_p2  ;;  %s622_s6 = scalar_lea.vmem %s209_s9, 128 }
  0x2e   : > { %p623_p9 = scmp.ne.s32.totalorder %s209_s9, %s622_s6  ;;  %s754_s11 = smov [#allocation7]  }
  0x2f   : > { %s627_s14 = sshll.u32 %s754_s11, 4  ;;  %s628_s14 = int_to_ptr.vmem [resolvable:$false] %s627_s14 }
  0x30   : > { %p625_p13 = pnand %p623_p9, %p611_p8  ;;  %s629_s16 = scalar_lea.vmem %s628_s14, 256 }
  0x31   : > { %p630_p6 = scmp.lt.s32.totalorder %s209_s9, %s628_s14  ;;  %p631_p11 = scmp.lt.s32.totalorder %s629_s16, %s622_s6 }
  0x32   : > { %p626_p4 = pneg %p625_p13 }
  0x33   : > { %p632_p5 = por %p631_p11, %p630_p6 }
  0x35   : > { %p633_p0 = pnand %p632_p5, %p626_p4 }
  0x37   : > { %636 = shalt.err (!%p633_p0)
}
  0x38   : > { %s755_s15 = smov 32   ;;  %s756_s24 = smov 2  }
  0x39   : > { %525 = dma.hbm_to_vmem [thread:$0]  (!%p864_p2), %s207_s30, 128, %s209_s9, %s197_s0, %s755_s15, %s755_s15, %s756_s24  }
  0x3a   : > { %220 = sbr.rel (%p854_p12) target bundleno = 149 (0x95), region = 32 }
  0x3f   : > { %714 = dma.done.wait (%p827_p3), [#allocation6], 16  }
  0x40   : > { %716 = vsyncadd (%p827_p3), [#allocation6], 4294967280  ;;  %s910_s12 = sand.u32 1, %s735_s18  }
  0x41   : > { %s483_s1 = sshll.u32 %s910_s12, 3  ;;  %s227_s23 = scalar_lea.sflag [#allocation4], %s910_s12 }
  0x42   : > { %s916_s0 = scalar_lea.vmem [#allocation7], %s483_s1 }
  0x43   : > { %718 = dma.done.wait (%p837_p7), %s227_s23, 128  }
  0x44   : > { %720 = vsyncadd (%p837_p7), %s227_s23, 4294967168 }
  0x45   : > { %235 = sfence }
  0x46   : > { %s261_s25 = sld [smem:[#allocation2]]  ;;  %v264_v0 = vld [vmem:[%s916_s0] sm:$0x3]  ;;  %s485_s5 = sshll.u32 %s910_s12, 1  ;;  %v487_v1 = vld [vmem:[%s916_s0 + $0x2] sm:$0x3] }
  0x47   : > { %s263_s7 = sld [smem:[#allocation3]]  ;;  %v489_v4 = vld [vmem:[%s916_s0 + $0x4] sm:$0x3]  ;;  %v491_v9 = vld [vmem:[%s916_s0 + $0x6] sm:$0x3]  ;;  %s260_s27 = scalar_lea.vmem [#allocation9], %s485_s5 }
  0x48   : > { %s486_s8 = sld [smem:[#allocation3 + $0x1]]  ;;  %s346_s9 = sshll.u32 %s260_s27, 4  ;;  %s928_s9 = int_to_ptr.vmem [resolvable:$true] %s346_s9 }
  0x49   : > { %s488_s26 = sld [smem:[#allocation3 + $0x2]]  ;;  %s503_s6 = sshll.u32 %s743_s20, 5 }
  0x4a   : > { %s490_s30 = sld [smem:[#allocation3 + $0x3]]  ;;  %s344_s16 = scalar_lea.hbm %s1014_s4, %s503_s6 }
  0x4b   : > { %s315_s15 = scalar_lea.sflag [#allocation10], %s910_s12  ;;  %s637_s24 = scalar_lea.vmem %s928_s9, 32 }
  0x4c   : > { %v262_v2 = vstv %s261_s25  ;;  %p638_p3 = scmp.ne.s32.totalorder %s928_s9, %s637_s24  ;;  %p1027_p7 = scmp.ne.s32.totalorder %s1020_s28, 0 }
  0x4d   : > { %v265_v3 = vstv %s263_s7  ;;  %s757_s23 = smov [#allocation9]  }
  0x4e   : > { %v266_v5 = vmul.f32 %v265_v3, %v264_v0  ;;  %v271_v6 = vstv %s486_s8  ;;  %p639_p12 = pnand %p638_p3, %p1027_p7  ;;  %s641_s25 = sshll.u32 %s757_s23, 4  ;;  %s642_s25 = int_to_ptr.vmem [resolvable:$false] %s641_s25 }
  0x4f   : > { %v272_v7 = vmul.f32 %v487_v1, %v271_v6  ;;  %v277_v8 = vstv %s488_s26  ;;  %s643_s7 = scalar_lea.vmem %s642_s25, 64  ;;  %p644_p1 = scmp.lt.s32.totalorder %s928_s9, %s642_s25 }
  0x50   : > { %v267_v10 = vadd.f32 %v266_v5, %v262_v2  ;;  %v278_v11 = vmul.f32 %v489_v4, %v277_v8  ;;  %v283_v12 = vstv %s490_s30  ;;  %p640_p2 = pneg %p639_p12  ;;  %p645_p10 = scmp.lt.s32.totalorder %s643_s7, %s637_s24 }
  0x51   : > { %v284_v14 = vmul.f32 %v491_v9, %v283_v12 }
  0x52   : > { %v273_v13 = vadd.f32 %v272_v7, %v267_v10  ;;  %p646_p8 = por %p645_p10, %p644_p1 }
  0x54   : > { %v279_v15 = vadd.f32 %v278_v11, %v273_v13  ;;  %p647_p9 = pnand %p646_p8, %p640_p2 }
  0x56   : > { %v285_v16 = vadd.f32 %v284_v14, %v279_v15 }
  0x58   : > { %286 = vst [vmem:[%s260_s27] sm:$0x3] %v285_v16  ;;  %v492_v17 = vmul.f32 -1.442695, %v285_v16 }
  0x59   : > { %650 = shalt.err (!%p647_p9)
}
  0x5a   : > { %s651_s8 = scalar_lea.hbm %s344_s16, 32  ;;  %s655_s5 = scalar_lea.hbm %s1014_s4, 64 }
  0x5b   : > { %p652_p13 = scmp.ne.s32.totalorder %s344_s16, %s651_s8  ;;  %p656_p11 = scmp.lt.s32.totalorder %s344_s16, %s1014_s4 }
  0x5c   : > { %p657_p5 = scmp.lt.s32.totalorder %s655_s5, %s651_s8 }
  0x5d   : > { %p653_p4 = pnand %p652_p13, %p1027_p7 }
  0x5e   : > { %p658_p0 = por %p657_p5, %p656_p11 }
  0x5f   : > { %p654_p6 = pneg %p653_p4 }
  0x61   : > { %p659_p3 = pnand %p658_p0, %p654_p6 }
  0x63   : > { %662 = shalt.err (!%p659_p3)
}
  0x64   : > { %515 = dma.vmem_to_hbm [thread:$0]  (%p1027_p7), %s928_s9, 32, %s344_s16, %s315_s15   ;;  %590 = vpow2.f32 %v492_v17  ;;  %v294_v20 = vld [vmem:[%s916_s0] sm:$0x3]  ;;  %v493_v22 = vld [vmem:[%s916_s0 + $0x2] sm:$0x3] }
  0x65   : > { %s253_s11 = scalar_lea.vmem [#allocation8], %s483_s1  ;;  %s507_s24 = sshll.u32 %s743_s20, 7  ;;  %v495_v23 = vld [vmem:[%s916_s0 + $0x4] sm:$0x3]  ;;  %v497_v24 = vld [vmem:[%s916_s0 + $0x6] sm:$0x3] }
  0x66   : > { %s329_s14 = sshll.u32 %s253_s11, 4  ;;  %s962_s16 = scalar_lea.hbm %s1013_s3, %s507_s24  ;;  %s957_s14 = int_to_ptr.vmem [resolvable:$true] %s329_s14 }
  0x67   : > { %s310_s20 = scalar_lea.sflag [#allocation5], %s910_s12  ;;  %s663_s1 = scalar_lea.vmem %s957_s14, 128 }
  0x68   : > { %p664_p12 = scmp.ne.s32.totalorder %s957_s14, %s663_s1  ;;  %s758_s0 = smov [#allocation8]  }
  0x69   : > { %s667_s15 = sshll.u32 %s758_s0, 4  ;;  %s668_s15 = int_to_ptr.vmem [resolvable:$false] %s667_s15 }
  0x6a   : > { %p665_p2 = pnand %p664_p12, %p1027_p7  ;;  %s669_s25 = scalar_lea.vmem %s668_s15, 256 }
  0x6b   : > { %p670_p10 = scmp.lt.s32.totalorder %s957_s14, %s668_s15  ;;  %p671_p8 = scmp.lt.s32.totalorder %s669_s25, %s663_s1 }
  0x6c   : > { %p666_p1 = pneg %p665_p2 }
  0x6d   : > { %p672_p9 = por %p671_p8, %p670_p10 }
  0x6f   : > { %p673_p13 = pnand %p672_p9, %p666_p1 }
  0x71   : > { %v591_v18 = vpop.eup %590 }
  0x72   : > { %v290_v19 = vadd.f32 1.0, %v591_v18 }
  0x74   : > { %592 = vrcp.f32 %v290_v19 }
  0x81   : > { %v593_v21 = vpop.eup %592 }
  0x82   : > { %v293_v25 = vadd.f32 1.0, %v593_v21 }
  0x84   : > { %v295_v26 = vmul.f32 %v294_v20, %v293_v25  ;;  %v298_v27 = vmul.f32 %v493_v22, %v293_v25  ;;  %v302_v28 = vmul.f32 %v495_v23, %v293_v25  ;;  %v306_v29 = vmul.f32 %v497_v24, %v293_v25 }
  0x86   : > { %296 = vst [vmem:[%s253_s11] sm:$0x3] %v295_v26  ;;  %494 = vst [vmem:[%s253_s11 + $0x2] sm:$0x3] %v298_v27 }
  0x87   : > { %496 = vst [vmem:[%s253_s11 + $0x4] sm:$0x3] %v302_v28  ;;  %498 = vst [vmem:[%s253_s11 + $0x6] sm:$0x3] %v306_v29 }
  0x88   : > { %676 = shalt.err (!%p673_p13)
}
  0x89   : > { %s677_s7 = scalar_lea.hbm %s962_s16, 128  ;;  %s681_s30 = scalar_lea.hbm %s1013_s3, 256 }
  0x8a   : > { %p678_p4 = scmp.ne.s32.totalorder %s962_s16, %s677_s7  ;;  %p682_p5 = scmp.lt.s32.totalorder %s962_s16, %s1013_s3 }
  0x8b   : > { %p683_p0 = scmp.lt.s32.totalorder %s681_s30, %s677_s7 }
  0x8c   : > { %p679_p6 = pnand %p678_p4, %p1027_p7 }
  0x8d   : > { %p684_p3 = por %p683_p0, %p682_p5 }
  0x8e   : > { %p680_p11 = pneg %p679_p6 }
  0x90   : > { %p685_p12 = pnand %p684_p3, %p680_p11 }
  0x92   : > { %688 = shalt.err (!%p685_p12)
}
  0x93   : > { %s759_s6 = smov 32   ;;  %s760_s11 = smov 2  }
  0x94   : > { %514 = dma.vmem_to_hbm [thread:$0]  (%p1027_p7), %s957_s14, 128, %s962_s16, %s310_s20, %s759_s6, %s759_s6, %s760_s11  }
  0x95 PF: > { %s358_s24 = sand.u32 1, %s731_s17   ;;  %p1028_p2 = scmp.ne.s32.totalorder %s1021_s29, 0 }
  0x96   : > { %p1029_p1 = scmp.ge.s32.totalorder %s751_s22, 2  ;;  %s359_s23 = scalar_lea.sflag [#allocation5], %s358_s24 }
  0x98   : > { %p527_p10 = pnand %p1029_p1, %p1028_p2 }
  0x9a   : > { %p528_p8 = pneg %p527_p10 }
  0x9c   : > { %722 = dma.done.wait (%p528_p8), %s359_s23, 128  }
  0x9d   : > { %724 = vsyncadd (%p528_p8), %s359_s23, 4294967168  ;;  %s368_s9 = scalar_lea.sflag [#allocation10], %s358_s24 }
  0x9e   : > { %726 = dma.done.wait (%p528_p8), %s368_s9, 32  }
  0x9f   : > { %728 = vsyncadd (%p528_p8), %s368_s9, 4294967264  ;;  %s26_s22 = sadd.s32 1, %s751_s22   ;;  %s1030_s17 = smov %s735_s18 }
  0xa0   : > { %p23_p9 = scmp.ge.s32.totalorder %s26_s22, 4   ;;  %s1031_s18 = smov %s739_s19 }
  0xa1   : > { %s1032_s19 = smov %s897_s13  ;;  %s1033_s20 = smov %s747_s21 }
  0xa2   : > { %s1034_s21 = smov %s1036_s10  ;;  %25 = sbr.rel (!%p23_p9) target bundleno = 12 (0xc), region = 105 }
  0xa7   :  { %373 = vsyncpa [#allocation4], 1 }
  0xa8   :  { %375 = vsyncpa [#allocation4 + $0x1], 1 }
  0xa9   :  { %376 = vsyncpa [#allocation5], 1 }
  0xaa   :  { %378 = vsyncpa [#allocation5 + $0x1], 1 }
  0xab   :  { %379 = vsyncpa [#allocation10], 1 }
  0xac   :  { %381 = vsyncpa [#allocation10 + $0x1], 1 }
  0xad   :  { %382 = vsyncpa [#allocation6], 1 }
  0xae   :  { %384 = vsyncpa [#allocation6 + $0x1], 1 }

</bundles_post_ra>
